<compile_context>
chip_gen: v7x
topology: tpu7x:2x2x1
jax: 0.10.0
libtpu: 0.0.40
codegen_flags: <defaults>
</compile_context>

<pallas_src>
import functools

import jax
import jax.numpy as jnp
from jax.experimental import pallas as pl
from jax.experimental.pallas import tpu as pltpu


def _round_up(a, b):
    return ((a + b - 1) // b) * b


def gate_kernel(x_ref, y_ref, w_ref, sel_ref, b_ref, o_ref):
    # x_ref, y_ref : (tm, W)  packed activations (G original rows per packed row)
    # w_ref        : (3, W)   folded weights, each tiled G times along lanes
    # sel_ref      : (W, G)   block-diagonal 0/1 selector for the segmented sum
    # b_ref        : (1,)     bias scalar (SMEM)
    # o_ref        : (tm, G)  sigmoid(logits)
    x = x_ref[...]
    y = y_ref[...]
    w = w_ref[...]
    wa = w[0:1, :]          # folded weight for x     (w0 + w3)
    wb = w[1:2, :]          # folded weight for y     (w1 - w3)
    wc = w[2:3, :]          # folded weight for x*y   (w2)

    # Elementwise work on the VPU, fully lane-dense.
    s = x * wa + y * wb + (x * y) * wc                      # (tm, W)

    # Segmented lane sum via one small MXU matmul:
    #   logits[r, g] = sum_d s[r, g*D + d]   (one logit per original row)
    logits = jnp.dot(s, sel_ref[...], preferred_element_type=jnp.float32)
    logits = logits + b_ref[0]
    o_ref[...] = jax.nn.sigmoid(logits).astype(o_ref.dtype)


@functools.partial(jax.jit, static_argnames=("tm_packed",))
def gate_forward(x, y, w, b, *, tm_packed=None):
    """x, y: [B, S, D]; w: [4D, 1]; b: [1, 1].  Returns [B, S, 1]."""
    B, S, D = x.shape
    M = B * S
    itemsize = jnp.dtype(x.dtype).itemsize

    # ---- pack G original rows per 128-lane row (free reshape in HBM) -------
    G = 128 // D if (D <= 128 and 128 % D == 0) else 1
    W = G * D
    R = pl.cdiv(M, G)                       # packed rows of real data

    # ---- pick the packed-row tile -------------------------------------------
    #  * large enough to amortize the ~0.35us/grid-step pipeline overhead
    #  * 2 inputs x 2 pipeline buffers must stay well inside VMEM on every
    #    generation (v7x: 64 MiB physical / 32 MiB scoped) -> 16 MiB budget.
    if tm_packed is None:
        vmem_input_budget = 16 * 1024 * 1024
        tm = min(2048, max(32, vmem_input_budget // (4 * W * itemsize)))
    else:
        tm = max(32, tm_packed)
    tm = _round_up(min(tm, _round_up(R, 32)), 32)   # sublane-safe, no huge pad
    # Keep >= 2 grid steps when there is enough work (v7x has 2 TensorCores).
    if R > 64 and _round_up(R, tm) // tm < 2:
        tm = _round_up(pl.cdiv(R, 2), 32)

    R_pad = _round_up(R, tm)
    M_pad = R_pad * G
    grid = (R_pad // tm,)

    # ---- prepare operands (all one-time, host/XLA side) ---------------------
    x2 = x.reshape(M, D)
    y2 = y.reshape(M, D)
    if M_pad != M:
        pad = ((0, M_pad - M), (0, 0))
        x2 = jnp.pad(x2, pad)
        y2 = jnp.pad(y2, pad)
    xp = x2.reshape(R_pad, W)
    yp = y2.reshape(R_pad, W)

    # Fold the 4 weight chunks into 3 (exact algebra), tile across the G slots.
    wq = w[:, 0].reshape(4, D)
    wa = wq[0] + wq[3]
    wb = wq[1] - wq[3]
    wc = wq[2]
    wrow = jnp.stack(
        [jnp.tile(wa, G), jnp.tile(wb, G), jnp.tile(wc, G)]
    ).astype(x.dtype)                                        # (3, W)

    # Block-diagonal selector: sel[i, g] = 1 iff lane i belongs to slot g.
    sel = (jnp.arange(W)[:, None] // D == jnp.arange(G)[None, :]).astype(x.dtype)

    bias = b.astype(jnp.float32).reshape(-1)[:1]             # (1,) scalar

    out = pl.pallas_call(
        gate_kernel,
        out_shape=jax.ShapeDtypeStruct((R_pad, G), x.dtype),
        grid_spec=pltpu.PrefetchScalarGridSpec(
            num_scalar_prefetch=0,
            grid=grid,
            in_specs=[
                pl.BlockSpec((tm, W), lambda i: (i, 0)),            # x (packed)
                pl.BlockSpec((tm, W), lambda i: (i, 0)),            # y (packed)
                pl.BlockSpec((3, W), lambda i: (0, 0)),             # folded weights
                pl.BlockSpec((W, G), lambda i: (0, 0)),             # selector
                pl.BlockSpec(memory_space=pltpu.MemorySpace.SMEM),  # bias scalar
            ],
            out_specs=pl.BlockSpec((tm, G), lambda i: (i, 0)),
        ),
        compiler_params=pltpu.CompilerParams(
            dimension_semantics=("parallel",)),
    )(xp, yp, wrow, sel, bias)

    return out.reshape(M_pad)[:M].reshape(B, S, 1)


def gate_reference(x, y, w, b):
    z = jnp.concatenate([x, y, x * y, x - y], axis=2)
    return jax.nn.sigmoid(z @ w + b[0, 0])


if __name__ == "__main__":
    B, S, D = 2, 8, 32  # input_dim = D = 32

    key = jax.random.PRNGKey(0)
    kx, ky, kw, kb = jax.random.split(key, 4)

    x = jax.random.normal(kx, (B, S, D), dtype=jnp.float32)
    y = jax.random.normal(ky, (B, S, D), dtype=jnp.float32)

    # Deterministic parameter init mimicking nn.Linear(4D, 1):
    # uniform(-1/sqrt(4D), 1/sqrt(4D)) for weight and bias.
    bound = 1.0 / jnp.sqrt(jnp.float32(4 * D))
    w = jax.random.uniform(kw, (4 * D, 1), dtype=jnp.float32,
                           minval=-bound, maxval=bound)
    b = jax.random.uniform(kb, (1, 1), dtype=jnp.float32,
                           minval=-bound, maxval=bound)

    out = gate_forward(x, y, w, b)
    jax.block_until_ready(out)

    ref = gate_reference(x, y, w, b)
    assert out.shape == (B, S, 1), out.shape
    assert jnp.allclose(out, ref, atol=1e-5, rtol=1e-5), "mismatch vs reference"

    print("KERNEL_OK")
</pallas_src>

<mosaic_0001>
module attributes {stable_mosaic.version = 11 : i64} {
  func.func @gate_kernel(%arg0: i32, %arg1: memref<32x128xf32, #tpu.memory_space<vmem>>, %arg2: memref<32x128xf32, #tpu.memory_space<vmem>>, %arg3: memref<3x128xf32, #tpu.memory_space<vmem>>, %arg4: memref<128x4xf32, #tpu.memory_space<vmem>>, %arg5: memref<1xf32, #tpu.memory_space<smem>>, %arg6: memref<32x4xf32, #tpu.memory_space<vmem>>) attributes {dimension_semantics = [#tpu.dimension_semantics<parallel>], iteration_bounds = array<i64: 1>, scalar_prefetch = 0 : i64, scratch_operands = 0 : i64, tpu.core_type = #tpu.core_type<tc>, window_params = [{transform_indices = @transform_0, window_bounds = array<i64: 32, 128>}, {transform_indices = @transform_1, window_bounds = array<i64: 32, 128>}, {pipeline_mode = #tpu.pipeline_mode<synchronous>, transform_indices = @transform_2, window_bounds = array<i64: 3, 128>}, {pipeline_mode = #tpu.pipeline_mode<synchronous>, transform_indices = @transform_3, window_bounds = array<i64: 128, 4>}, {transform_indices = @transform_4, window_bounds = array<i64: 1>}, {transform_indices = @transform_5, window_bounds = array<i64: 32, 4>}]} {
    %c0 = arith.constant 0 : index
    %c0_0 = arith.constant 0 : index
    %0 = vector.load %arg1[%c0, %c0_0] : memref<32x128xf32, #tpu.memory_space<vmem>>, vector<32x128xf32>
    %c0_1 = arith.constant 0 : index
    %c0_2 = arith.constant 0 : index
    %1 = vector.load %arg2[%c0_1, %c0_2] : memref<32x128xf32, #tpu.memory_space<vmem>>, vector<32x128xf32>
    %c0_3 = arith.constant 0 : index
    %c0_4 = arith.constant 0 : index
    %2 = vector.load %arg3[%c0_3, %c0_4] : memref<3x128xf32, #tpu.memory_space<vmem>>, vector<3x128xf32>
    %3 = vector.extract_strided_slice %2 {offsets = [0, 0], sizes = [1, 128], strides = [1, 1]} : vector<3x128xf32> to vector<1x128xf32>
    %4 = vector.extract_strided_slice %2 {offsets = [1, 0], sizes = [1, 128], strides = [1, 1]} : vector<3x128xf32> to vector<1x128xf32>
    %5 = vector.extract_strided_slice %2 {offsets = [2, 0], sizes = [1, 128], strides = [1, 1]} : vector<3x128xf32> to vector<1x128xf32>
    %6 = vector.broadcast %3 : vector<1x128xf32> to vector<32x128xf32>
    %7 = arith.mulf %0, %6 : vector<32x128xf32>
    %8 = vector.broadcast %4 : vector<1x128xf32> to vector<32x128xf32>
    %9 = arith.mulf %1, %8 : vector<32x128xf32>
    %10 = arith.addf %7, %9 : vector<32x128xf32>
    %11 = arith.mulf %0, %1 : vector<32x128xf32>
    %12 = vector.broadcast %5 : vector<1x128xf32> to vector<32x128xf32>
    %13 = arith.mulf %11, %12 : vector<32x128xf32>
    %14 = arith.addf %10, %13 : vector<32x128xf32>
    %c0_5 = arith.constant 0 : index
    %c0_6 = arith.constant 0 : index
    %15 = vector.load %arg4[%c0_5, %c0_6] : memref<128x4xf32, #tpu.memory_space<vmem>>, vector<128x4xf32>
    %cst = arith.constant dense<0.000000e+00> : vector<32x4xf32>
    %16 = tpu.matmul %14, %15, %cst {dimension_numbers = #tpu.dot_dimension_numbers<[1], [0], [0], [1], [0, 0, 1, 1], [], []>} : vector<32x128xf32>, vector<128x4xf32>, vector<32x4xf32> -> vector<32x4xf32>
    %c0_7 = arith.constant 0 : index
    %17 = memref.load %arg5[%c0_7] : memref<1xf32, #tpu.memory_space<smem>>
    %18 = vector.broadcast %17 : f32 to vector<32x4xf32>
    %19 = arith.addf %16, %18 : vector<32x4xf32>
    %20 = arith.negf %19 : vector<32x4xf32>
    %21 = math.exp %20 : vector<32x4xf32>
    %cst_8 = arith.constant 1.000000e+00 : f32
    %22 = vector.broadcast %cst_8 : f32 to vector<32x4xf32>
    %23 = arith.addf %22, %21 : vector<32x4xf32>
    %24 = arith.divf %22, %23 : vector<32x4xf32>
    %c0_9 = arith.constant 0 : index
    %c0_10 = arith.constant 0 : index
    %25 = vector.load %arg6[%c0_9, %c0_10] : memref<32x4xf32, #tpu.memory_space<vmem>>, vector<32x4xf32>
    tpu.vector_store %arg6[%c0_9, %c0_10], %24 {strides = array<i32>} : memref<32x4xf32, #tpu.memory_space<vmem>>, vector<32x4xf32>,
    return
  }
  func.func @transform_0(%arg0: i32) -> (i32, i32) {
    %c0_i32 = arith.constant 0 : i32
    %c0_i32_0 = arith.constant 0 : i32
    return %arg0, %c0_i32 : i32, i32
  }
  func.func @transform_1(%arg0: i32) -> (i32, i32) {
    %c0_i32 = arith.constant 0 : i32
    %c0_i32_0 = arith.constant 0 : i32
    return %arg0, %c0_i32 : i32, i32
  }
  func.func @transform_2(%arg0: i32) -> (i32, i32) {
    %c0_i32 = arith.constant 0 : i32
    %c0_i32_0 = arith.constant 0 : i32
    %c0_i32_1 = arith.constant 0 : i32
    return %c0_i32, %c0_i32_0 : i32, i32
  }
  func.func @transform_3(%arg0: i32) -> (i32, i32) {
    %c0_i32 = arith.constant 0 : i32
    %c0_i32_0 = arith.constant 0 : i32
    %c0_i32_1 = arith.constant 0 : i32
    return %c0_i32, %c0_i32_0 : i32, i32
  }
  func.func @transform_4(%arg0: i32) -> i32 {
    %c0_i32 = arith.constant 0 : i32
    %c0_i32_0 = arith.constant 0 : i32
    return %c0_i32 : i32
  }
  func.func @transform_5(%arg0: i32) -> (i32, i32) {
    %c0_i32 = arith.constant 0 : i32
    %c0_i32_0 = arith.constant 0 : i32
    return %arg0, %c0_i32 : i32, i32
  }
}

</mosaic_0001>

<bundles_post_ra>
// kernel: squeeze.5
= control target key start
LH: loop header
LB: loop body
LE: loop exit
PB: predicated region body
PF: predicated region fallthrough
CT: control target
= control target key end

     0   :  { %s37_s8 = smov 32   ;;  %vm7_vm0 = vcmask 261120   ;;  %s38_s9 = smov 64   ;;  %s55_s0 = inlined_call_operand.vmem [shape: f32[128], index: 0, kind: input, shape index: {}]   ;;  %s56_s1 = inlined_call_operand.vmem [shape: f32[4,32], index: 1, kind: output, shape index: {}]  }
   0x1   :  { %v4_v0 = vld [vmem:[%s55_s0] sm:$0x1]  ;;  %s36_s0 = smov 96  }
   0x2   :  { %5 = vst [vmem:[#allocation1] sm:$0x1] %v4_v0 }
   0x9   :  { %v9_v1 = vld [vmem:[#allocation1] sm:$0x1]  }
   0xa   :  { %v21_v2 = vld [vmem:[#allocation1] sm:$0x1]   ;;  %10 = vrot.lane.b32.xlu0 %v9_v1, %s36_s0 }
   0xb   :  { %22 = vrot.lane.b32.xlu1 %v21_v2, %s37_s8  ;;  %v6_v3 = vld [vmem:[#allocation1] sm:$0x1]  }
   0xc   :  { %v15_v4 = vld [vmem:[#allocation1] sm:$0x1]   ;;  %8 = vst.msk [vmem:[#allocation0] sm:$0x1] %vm7_vm0, %v6_v3  }
   0xe   :  { %16 = vrot.lane.b32.xlu0 %v15_v4, %s38_s9 }
  0x7c   :  { %v11_v5 = vpop.permute.xlu0 %10  }
  0x7d   :  { %v23_v6 = vpop.permute.xlu1 %22   ;;  %14 = vst.msk [vmem:[#allocation0 + $0x1] sm:$0x1] %vm7_vm0, %v11_v5  }
  0x7e   :  { %26 = vst.msk [vmem:[#allocation0 + $0x3] sm:$0x1] %vm7_vm0, %v23_v6  }
  0x80   :  { %v17_v7 = vpop.permute.xlu0 %16  }
  0x81   :  { %20 = vst.msk [vmem:[#allocation0 + $0x2] sm:$0x1] %vm7_vm0, %v17_v7  }
  0x88   :  { %v30_v8 = vld [vmem:[#allocation0] sm:$0xf] }
  0x89   :  { %32 = vst [vmem:[%s56_s1] sm:$0xf] %v30_v8 }

// kernel: tile.17
= control target key start
LH: loop header
LB: loop body
LE: loop exit
PB: predicated region body
PF: predicated region fallthrough
CT: control target
= control target key end

     0   :  { %s22_s0 = inlined_call_operand.vmem [shape: f32[32], index: 0, kind: input, shape index: {}]   ;;  %s23_s1 = inlined_call_operand.vmem [shape: f32[4,32], index: 1, kind: output, shape index: {}]  }
   0x1   :  { %v4_v0 = vld [vmem:[%s22_s0] ss:$0 sm:$0xff] }
   0x2   :  { %5 = vst [vmem:[%s23_s1] sm:$0xf] %v4_v0 }

// kernel: tile.25
= control target key start
LH: loop header
LB: loop body
LE: loop exit
PB: predicated region body
PF: predicated region fallthrough
CT: control target
= control target key end

     0   :  { %vm7_vm0 = vcmask 261120   ;;  %s37_s8 = smov 32   ;;  %s38_s9 = smov 64   ;;  %vm13_vm1 = vcmask 1048320   ;;  %vm19_vm2 = vcmask 785920   ;;  %vm25_vm3 = vcmask 523520   ;;  %s55_s0 = inlined_call_operand.vmem [shape: f32[4,32], index: 0, kind: input, shape index: {}]   ;;  %s56_s1 = inlined_call_operand.vmem [shape: f32[1,128], index: 1, kind: output, shape index: {}]  }
   0x1   :  { %v4_v0 = vld [vmem:[%s55_s0] sm:$0xf]  ;;  %s36_s0 = smov 96  }
   0x2   :  { %5 = vst [vmem:[#allocation1] sm:$0xf] %v4_v0 }
   0x9   :  { %v10_v1 = vld [vmem:[#allocation1 + $0x3] sm:$0x1]   ;;  %v22_v2 = vld [vmem:[#allocation1 + $0x1] sm:$0x1]   ;;  %v6_v3 = vld [vmem:[#allocation1] sm:$0x1]  }
   0xa   :  { %11 = vrot.lane.b32.xlu0 %v10_v1, %s36_s0  ;;  %23 = vrot.lane.b32.xlu1 %v22_v2, %s37_s8  ;;  %v16_v4 = vld [vmem:[#allocation1 + $0x2] sm:$0x1]   ;;  %8 = vst.msk [vmem:[#allocation0] sm:$0x1] %vm7_vm0, %v6_v3  }
   0xe   :  { %17 = vrot.lane.b32.xlu0 %v16_v4, %s38_s9 }
  0x7c   :  { %v12_v5 = vpop.permute.xlu0 %11   ;;  %v24_v6 = vpop.permute.xlu1 %23  }
  0x7d   :  { %14 = vst.msk [vmem:[#allocation0] sm:$0x1] %vm13_vm1, %v12_v5  }
  0x80   :  { %v18_v7 = vpop.permute.xlu0 %17  }
  0x81   :  { %20 = vst.msk [vmem:[#allocation0] sm:$0x1] %vm19_vm2, %v18_v7  }
  0x82   :  { %26 = vst.msk [vmem:[#allocation0] sm:$0x1] %vm25_vm3, %v24_v6  }
  0x89   :  { %v30_v8 = vld [vmem:[#allocation0] sm:$0x1] }
  0x8a   :  { %32 = vst [vmem:[%s56_s1] sm:$0x1] %v30_v8 }

// kernel: gate_forward.1
= control target key start
LH: loop header
LB: loop body
LE: loop exit
PB: predicated region body
PF: predicated region fallthrough
CT: control target
= control target key end

     0   :  { %v30_v0 = vlaneseq  ;;  %vm193_vm0 = vcmask 31744   ;;  %s448_s3 = inlined_call_operand.vmem [shape: f32[128,4], index: 3, kind: input, shape index: {}]   ;;  %s449_s0 = inlined_call_operand.vmem [shape: f32[32,128], index: 0, kind: input, shape index: {}]   ;;  %s450_s1 = inlined_call_operand.vmem [shape: f32[32,128], index: 1, kind: input, shape index: {}]   ;;  %s451_s2 = inlined_call_operand.vmem [shape: f32[3,128], index: 2, kind: input, shape index: {}]   ;;  %s452_s4 = inlined_call_operand.<no memory space> [shape: f32[1], index: 4, kind: input, shape index: {}]   ;;  %s453_s5 = inlined_call_operand.vmem [shape: f32[32,4], index: 5, kind: output, shape index: {}]  }
   0x1   :  { %v66_v1 = vld [vmem:[%s448_s3] sm:$0xff]  ;;  %v67_v2 = vld [vmem:[%s448_s3 + $0x8] sm:$0xff]  ;;  %v68_v3 = vld [vmem:[%s448_s3 + $0x10] sm:$0xff] }
   0x2   :  { %v264_v4 = vpack.c.bf16 %v67_v2, %v66_v1  ;;  %v69_v5 = vld [vmem:[%s448_s3 + $0x18] sm:$0xff]  ;;  %v31_v6 = vshrl.u32 %v30_v0, 7  ;;  %v70_v8 = vld [vmem:[%s448_s3 + $0x20] sm:$0xff]  ;;  %v71_v9 = vld [vmem:[%s448_s3 + $0x28] sm:$0xff]  ;;  %v83_v1 = vstv %s452_s4 }
   0x3   :  { %v268_v7 = vpack.c.bf16 %v69_v5, %v68_v3  ;;  %v72_v13 = vld [vmem:[%s448_s3 + $0x30] sm:$0xff]  ;;  %v272_v14 = vpack.c.bf16 %v71_v9, %v70_v8  ;;  %v73_v15 = vld [vmem:[%s448_s3 + $0x38] sm:$0xff]  ;;  %v21_v16 = vld [vmem:[%s449_s0] sm:$0xff] }
   0x4   :  { %265 = vmatprep.subr.bf16.mxu0 %v264_v4  ;;  %296 = vmatprep.subr.bf16.mxu1 %v264_v4  ;;  %v32_v10 = vsub.s32 0, %v31_v6  ;;  %v40_v11 = vsub.s32 1, %v31_v6  ;;  %v56_v12 = vsub.s32 2, %v31_v6  ;;  %v25_v17 = vld [vmem:[%s450_s1] sm:$0xff]  ;;  %v23_v20 = vld [vmem:[%s449_s0 + $0x10] sm:$0xff]  ;;  %v276_v26 = vpack.c.bf16 %v73_v15, %v72_v13  ;;  %v75_v31 = vld [vmem:[%s448_s3 + $0x48] sm:$0xff] }
   0x5   :  { %267 = vmatpush3.bf16.msra.mxu0 %v264_v4  ;;  %304 = vmatpush3.bf16.msra.mxu1 %v264_v4  ;;  %v29_v18 = vld [vmem:[%s451_s2] sm:$0x7]  ;;  %v50_v19 = vmul.f32 %v25_v17, %v21_v16  ;;  %v27_v21 = vld [vmem:[%s450_s1 + $0x10] sm:$0xff]  ;;  %v77_v40 = vld [vmem:[%s448_s3 + $0x58] sm:$0xff] }
   0x6   :  { %269 = vmatprep.subr.bf16.mxu0 %v268_v7  ;;  %297 = vmatprep.subr.bf16.mxu1 %v268_v7  ;;  %v33_v22 = vrot.slane %v29_v18, %v32_v10  ;;  %v41_v23 = vrot.slane %v29_v18, %v40_v11  ;;  %v57_v24 = vrot.slane %v29_v18, %v56_v12  ;;  %v74_v30 = vld [vmem:[%s448_s3 + $0x40] sm:$0xff]  ;;  %v76_v39 = vld [vmem:[%s448_s3 + $0x50] sm:$0xff]  ;;  %v79_v44 = vld [vmem:[%s448_s3 + $0x68] sm:$0xff] }
   0x7   :  { %v52_v25 = vmul.f32 %v27_v21, %v23_v20  ;;  %v280_v37 = vpack.c.bf16 %v75_v31, %v74_v30  ;;  %v284_v42 = vpack.c.bf16 %v77_v40, %v76_v39  ;;  %v78_v43 = vld [vmem:[%s448_s3 + $0x60] sm:$0xff]  ;;  %v22_v45 = vld [vmem:[%s449_s0 + $0x8] sm:$0xff]  ;;  %v24_v47 = vld [vmem:[%s449_s0 + $0x18] sm:$0xff] }
   0x8   :  { %v34_v27 = vmul.f32 %v33_v22, %v21_v16  ;;  %v42_v28 = vmul.f32 %v41_v23, %v25_v17  ;;  %v58_v29 = vmul.f32 %v57_v24, %v50_v19  ;;  %v36_v32 = vmul.f32 %v33_v22, %v23_v20  ;;  %v26_v46 = vld [vmem:[%s450_s1 + $0x8] sm:$0xff]  ;;  %v28_v48 = vld [vmem:[%s450_s1 + $0x18] sm:$0xff]  ;;  %v80_v50 = vld [vmem:[%s448_s3 + $0x70] sm:$0xff] }
   0x9   :  { %271 = vmatpush3.bf16.msra.mxu0 %v268_v7  ;;  %305 = vmatpush3.bf16.msra.mxu1 %v268_v7  ;;  %v44_v33 = vmul.f32 %v41_v23, %v27_v21  ;;  %v60_v34 = vmul.f32 %v57_v24, %v52_v25  ;;  %v288_v49 = vpack.c.bf16 %v79_v44, %v78_v43  ;;  %v81_v51 = vld [vmem:[%s448_s3 + $0x78] sm:$0xff] }
   0xa   :  { %273 = vmatprep.subr.bf16.mxu0 %v272_v14  ;;  %298 = vmatprep.subr.bf16.mxu1 %v272_v14  ;;  %v46_v35 = vadd.f32 %v42_v28, %v34_v27  ;;  %v35_v52 = vmul.f32 %v33_v22, %v22_v45  ;;  %v51_v53 = vmul.f32 %v26_v46, %v22_v45 }
   0xb   :  { %v48_v36 = vadd.f32 %v44_v33, %v36_v32  ;;  %v43_v54 = vmul.f32 %v41_v23, %v26_v46  ;;  %v37_v55 = vmul.f32 %v33_v22, %v24_v47  ;;  %v45_v56 = vmul.f32 %v41_v23, %v28_v48 }
   0xc   :  { %v62_v38 = vadd.f32 %v58_v29, %v46_v35  ;;  %v53_v57 = vmul.f32 %v28_v48, %v24_v47  ;;  %v292_v58 = vpack.c.bf16 %v81_v51, %v80_v50  ;;  %v59_v60 = vmul.f32 %v57_v24, %v51_v53 }
   0xd   :  { %275 = vmatpush3.bf16.msra.mxu0 %v272_v14  ;;  %306 = vmatpush3.bf16.msra.mxu1 %v272_v14  ;;  %v64_v41 = vadd.f32 %v60_v34, %v48_v36  ;;  %v47_v59 = vadd.f32 %v43_v54, %v35_v52  ;;  %v49_v61 = vadd.f32 %v45_v56, %v37_v55 }
   0xe   :  { %277 = vmatprep.subr.bf16.mxu0 %v276_v26  ;;  %299 = vmatprep.subr.bf16.mxu1 %v276_v26  ;;  %v61_v62 = vmul.f32 %v57_v24, %v53_v57 }
   0xf   :  { %258 = vmatprep.mubr.f32.mxu0 %v62_v38  ;;  %261 = vmatprep.mubr.f32.mxu1 %v64_v41  ;;  %v63_v63 = vadd.f32 %v59_v60, %v47_v59 }
  0x10   :  { %v65_v0 = vadd.f32 %v61_v62, %v49_v61 }
  0x11   :  { %279 = vmatpush3.bf16.msra.mxu0 %v276_v26  ;;  %307 = vmatpush3.bf16.msra.mxu1 %v276_v26 }
  0x12   :  { %281 = vmatprep.subr.bf16.mxu0 %v280_v37  ;;  %300 = vmatprep.subr.bf16.mxu1 %v280_v37 }
  0x15   :  { %283 = vmatpush3.bf16.msra.mxu0 %v280_v37  ;;  %308 = vmatpush3.bf16.msra.mxu1 %v280_v37 }
  0x16   :  { %285 = vmatprep.subr.bf16.mxu0 %v284_v42  ;;  %301 = vmatprep.subr.bf16.mxu1 %v284_v42 }
  0x19   :  { %287 = vmatpush3.bf16.msra.mxu0 %v284_v42  ;;  %309 = vmatpush3.bf16.msra.mxu1 %v284_v42 }
  0x1a   :  { %289 = vmatprep.subr.bf16.mxu0 %v288_v49  ;;  %302 = vmatprep.subr.bf16.mxu1 %v288_v49 }
  0x1d   :  { %291 = vmatpush3.bf16.msra.mxu0 %v288_v49  ;;  %310 = vmatpush3.bf16.msra.mxu1 %v288_v49 }
  0x1e   :  { %293 = vmatprep.subr.bf16.mxu0 %v292_v58  ;;  %303 = vmatprep.subr.bf16.mxu1 %v292_v58 }
  0x21   :  { %295 = vmatpush3.bf16.msra.mxu0 %v292_v58  ;;  %311 = vmatpush3.bf16.msra.mxu1 %v292_v58 }
  0x24   :  { %259 = vmatmul.mubr.f32.vlgmr.msra.gmra.mrb[0].mxu0 %v63_v63  ;;  %262 = vmatmul.mubr.f32.vlgmr.msra.gmra.mrb[0].mxu1 %v65_v0 }
  0xf7   :  { %v260_v2 = vpop.f32.mrb[0].mxu0  ;;  %v263_v3 = vpop.f32.mrb[0].mxu1 }
  0xf8   :  { %v156_v4 = vadd.f32 %v260_v2, %v83_v1  ;;  %v166_v5 = vadd.f32 %v263_v3, %v83_v1  ;;  %v150_v6 = vpop.f32.mrb[1].mxu0  ;;  %v160_v7 = vpop.f32.mrb[1].mxu1 }
  0xf9   :  { %v151_v8 = vadd.f32 %v150_v6, %v83_v1  ;;  %v161_v9 = vadd.f32 %v160_v7, %v83_v1 }
  0xfa   :  { %v203_v10 = vmul.f32 -1.442695, %v156_v4  ;;  %v205_v11 = vmul.f32 -1.442695, %v166_v5 }
  0xfb   :  { %v202_v12 = vmul.f32 -1.442695, %v151_v8  ;;  %v204_v13 = vmul.f32 -1.442695, %v161_v9 }
  0xfc   :  { %312 = vpow2.f32 %v203_v10 }
  0xfd   :  { %314 = vpow2.f32 %v205_v11 }
  0xfe   :  { %316 = vpow2.f32 %v202_v12 }
  0xff   :  { %318 = vpow2.f32 %v204_v13 }
 0x106   :  { %v313_v14 = vpop.eup %312 }
 0x107   :  { %v315_v15 = vpop.eup %314  ;;  %v182_v16 = vadd.f32 1.0, %v313_v14 }
 0x108   :  { %v317_v17 = vpop.eup %316  ;;  %v184_v18 = vadd.f32 1.0, %v315_v15 }
 0x109   :  { %v319_v19 = vpop.eup %318  ;;  %320 = vrcp.f32 %v182_v16  ;;  %v181_v20 = vadd.f32 1.0, %v317_v17 }
 0x10a   :  { %322 = vrcp.f32 %v184_v18  ;;  %v183_v21 = vadd.f32 1.0, %v319_v19 }
 0x10b   :  { %324 = vrcp.f32 %v181_v20 }
 0x10c   :  { %326 = vrcp.f32 %v183_v21 }
 0x113   :  { %v321_v22 = vpop.eup %320 }
 0x114   :  { %v323_v23 = vpop.eup %322  ;;  %195 = vst.msk [vmem:[%s453_s5 + $0x8] sm:$0xff] %vm193_vm0, %v321_v22 }
 0x115   :  { %v325_v24 = vpop.eup %324  ;;  %197 = vst.msk [vmem:[%s453_s5 + $0x18] sm:$0xff] %vm193_vm0, %v323_v23 }
 0x116   :  { %v327_v25 = vpop.eup %326  ;;  %194 = vst.msk [vmem:[%s453_s5] sm:$0xff] %vm193_vm0, %v325_v24 }
 0x117   :  { %196 = vst.msk [vmem:[%s453_s5 + $0x10] sm:$0xff] %vm193_vm0, %v327_v25 }

</bundles_post_ra>
